<compile_context>
chip_gen: v5e
topology: v5e:2x2
jax: 0.10.0
libtpu: 0.0.40
codegen_flags: <defaults>
</compile_context>

<pallas_src>
import jax
import jax.numpy as jnp
from jax.experimental import pallas as pl
from jax.experimental.pallas import tpu as pltpu


def _round_up(x, m):
    return ((x + m - 1) // m) * m


def _feature_reduction_kernel(x_ref, w_ref, b_ref, o_ref):
    # x_ref: (tm, S*D)   contiguous row slab (all subbands)
    # w_ref: (S*D, S*H)  block-diagonal weight, VMEM-resident (constant index_map)
    # b_ref: (1, S*H)    all biases, flattened to the output layout
    # o_ref: (tm, S*H)   lane-dense output slab (single unmasked store)
    y = jnp.dot(x_ref[...], w_ref[...], preferred_element_type=jnp.float32)
    o_ref[...] = (y + b_ref[...]).astype(o_ref.dtype)


def _vmem_footprint_bytes(tm, SD, SH, in_bytes, w_bytes):
    # double-buffered input + output slabs, (conservatively) double-buffered weights, bias
    return (2 * tm * SD * in_bytes
            + 2 * tm * SH * 4
            + 2 * SD * SH * w_bytes
            + 2 * SH * 4)


def feature_reduction(embeddings, weights, biases, *, tm=1024, input_dtype=None):
    """embeddings: [B, T, S*D] float32
       weights:    [S, D, 32]  (pre-transposed nn.Linear weights: y = x @ W[s] + b[s])
       biases:     [S, 32]
       input_dtype: optionally jnp.bfloat16 for x/W (f32 accumulate + f32 output)
       returns:    [B, T, S*32] float32
    """
    B, T, SD = embeddings.shape
    S, D, H = weights.shape
    assert SD == S * D
    SH = S * H
    BT = B * T

    x = embeddings.reshape(BT, SD)

    # Block-diagonal weight: one dense MXU pass replaces S narrow N=32 matmuls and
    # the S masked 32-lane stores (the "lane-dense store" lever).
    w_bd = jnp.zeros((SD, SH), dtype=weights.dtype)
    for s in range(S):
        w_bd = w_bd.at[s * D:(s + 1) * D, s * H:(s + 1) * H].set(weights[s])
    b_flat = biases.reshape(1, SH).astype(jnp.float32)

    if input_dtype is not None:
        x = x.astype(input_dtype)
        w_bd = w_bd.astype(input_dtype)
    in_bytes = jnp.dtype(x.dtype).itemsize
    w_bytes = jnp.dtype(w_bd.dtype).itemsize

    # ---- Row-tile selection --------------------------------------------------
    vmem_budget = 36 * 1024 * 1024  # keeps the footprint comfortable on v7x (64 MiB/TC)
    if BT <= 8:
        tm_eff = BT  # block == full array dim (allowed by the (8,128) rule)
    else:
        tm_eff = _round_up(min(tm, _round_up(BT, 8)), 8)
        while (_vmem_footprint_bytes(tm_eff, SD, SH, in_bytes, w_bytes) > vmem_budget
               and tm_eff > 8):
            tm_eff = max(8, _round_up(tm_eff // 2, 8))
        # keep >=2 grid steps so the "parallel" row axis can shard across the two
        # TensorCores on v7x instead of collapsing to grid=(1,)
        if pl.cdiv(BT, tm_eff) < 2:
            tm_eff = max(8, _round_up(pl.cdiv(BT, 2), 8))

    # No jnp.pad / trailing slice: Pallas handles the ragged last row tile.
    grid = (pl.cdiv(BT, tm_eff),)

    footprint = _vmem_footprint_bytes(tm_eff, SD, SH, in_bytes, w_bytes)
    vmem_limit = int(min(48 * 1024 * 1024, max(16 * 1024 * 1024, footprint * 13 // 10)))

    out = pl.pallas_call(
        _feature_reduction_kernel,
        out_shape=jax.ShapeDtypeStruct((BT, SH), jnp.float32),
        grid_spec=pltpu.PrefetchScalarGridSpec(
            num_scalar_prefetch=0,
            grid=grid,
            in_specs=[
                # one contiguous row slab per step
                pl.BlockSpec((tm_eff, SD), lambda i: (i, 0)),
                # constant block index -> weight / bias stay VMEM-resident
                pl.BlockSpec((SD, SH), lambda i: (0, 0)),
                pl.BlockSpec((1, SH), lambda i: (0, 0)),
            ],
            out_specs=pl.BlockSpec((tm_eff, SH), lambda i: (i, 0)),
        ),
        compiler_params=pltpu.CompilerParams(
            dimension_semantics=("parallel",),
            vmem_limit_bytes=vmem_limit,
        ),
        cost_estimate=pl.CostEstimate(
            flops=2 * BT * SD * SH,
            transcendentals=0,
            bytes_accessed=(BT * SD * in_bytes + BT * SH * 4
                            + SD * SH * w_bytes + SH * 4),
        ),
    )(x, w_bd, b_flat)

    # [B*T, S*H] -> [B, T, S*H]  (matches torch.cat(dim=-1)); no transpose needed.
    return out.reshape(B, T, SH)


def feature_reduction_ref(embeddings, weights, biases):
    """Pure-JAX reference mirroring the PyTorch loop."""
    B, T, SD = embeddings.shape
    S, D, H = weights.shape
    outs = []
    for s in range(S):
        patch = embeddings[:, :, s * D:(s + 1) * D]
        outs.append(jnp.einsum("btd,dh->bth", patch, weights[s]) + biases[s])
    return jnp.concatenate(outs, axis=-1)


if __name__ == "__main__":
    # small, module-consistent shapes
    B, T = 2, 16
    subband_num = 4
    D = 128          # patch_len (module default is 512; kept small for the demo)
    H = 32

    key = jax.random.PRNGKey(0)
    k_x, k_w, k_b = jax.random.split(key, 3)

    embeddings = jax.random.normal(k_x, (B, T, subband_num * D), dtype=jnp.float32)
    # deterministic per-subband Linear(D, 32) params, stored as [S, D, 32] / [S, 32]
    weights = jax.random.normal(k_w, (subband_num, D, H), dtype=jnp.float32) * 0.02
    biases = jax.random.normal(k_b, (subband_num, H), dtype=jnp.float32) * 0.01

    ref = feature_reduction_ref(embeddings, weights, biases)

    # f32 path (exact parity with the PyTorch module)
    out = feature_reduction(embeddings, weights, biases)
    out = jax.block_until_ready(out)
    assert out.shape == (B, T, subband_num * H), out.shape
    assert jnp.allclose(out, ref, atol=1e-4, rtol=1e-4), "mismatch vs reference (f32)"

    # bf16-input path (bandwidth optimization; f32 accumulate + output)
    out_bf16 = feature_reduction(embeddings, weights, biases, input_dtype=jnp.bfloat16)
    out_bf16 = jax.block_until_ready(out_bf16)
    assert jnp.allclose(out_bf16, ref, atol=5e-2, rtol=5e-2), "mismatch vs reference (bf16)"

    print("KERNEL_OK")
</pallas_src>

<mosaic_0001>
module attributes {stable_mosaic.version = 11 : i64} {
  func.func @_feature_reduction_kernel(%arg0: i32, %arg1: memref<16x512xf32, #tpu.memory_space<vmem>>, %arg2: memref<512x128xf32, #tpu.memory_space<vmem>>, %arg3: memref<1x128xf32, #tpu.memory_space<vmem>>, %arg4: memref<16x128xf32, #tpu.memory_space<vmem>>) attributes {dimension_semantics = [#tpu.dimension_semantics<parallel>], iteration_bounds = array<i64: 2>, scalar_prefetch = 0 : i64, scratch_operands = 0 : i64, tpu.core_type = #tpu.core_type<tc>, window_params = [{transform_indices = @transform_0, window_bounds = array<i64: 16, 512>}, {pipeline_mode = #tpu.pipeline_mode<synchronous>, transform_indices = @transform_1, window_bounds = array<i64: 512, 128>}, {pipeline_mode = #tpu.pipeline_mode<synchronous>, transform_indices = @transform_2, window_bounds = array<i64: 1, 128>}, {transform_indices = @transform_3, window_bounds = array<i64: 16, 128>}]} {
    %c0 = arith.constant 0 : index
    %c0_0 = arith.constant 0 : index
    %0 = vector.load %arg1[%c0, %c0_0] : memref<16x512xf32, #tpu.memory_space<vmem>>, vector<16x512xf32>
    %c0_1 = arith.constant 0 : index
    %c0_2 = arith.constant 0 : index
    %1 = vector.load %arg2[%c0_1, %c0_2] : memref<512x128xf32, #tpu.memory_space<vmem>>, vector<512x128xf32>
    %cst = arith.constant dense<0.000000e+00> : vector<16x128xf32>
    %2 = tpu.matmul %0, %1, %cst {dimension_numbers = #tpu.dot_dimension_numbers<[1], [0], [0], [1], [0, 0, 1, 1], [], []>} : vector<16x512xf32>, vector<512x128xf32>, vector<16x128xf32> -> vector<16x128xf32>
    %c0_3 = arith.constant 0 : index
    %c0_4 = arith.constant 0 : index
    %3 = vector.load %arg3[%c0_3, %c0_4] : memref<1x128xf32, #tpu.memory_space<vmem>>, vector<1x128xf32>
    %4 = vector.broadcast %3 : vector<1x128xf32> to vector<16x128xf32>
    %5 = arith.addf %2, %4 : vector<16x128xf32>
    %c0_5 = arith.constant 0 : index
    %c0_6 = arith.constant 0 : index
    %6 = vector.load %arg4[%c0_5, %c0_6] : memref<16x128xf32, #tpu.memory_space<vmem>>, vector<16x128xf32>
    tpu.vector_store %arg4[%c0_5, %c0_6], %5 {strides = array<i32>} : memref<16x128xf32, #tpu.memory_space<vmem>>, vector<16x128xf32>,
    return
  }
  func.func @transform_0(%arg0: i32) -> (i32, i32) {
    %c0_i32 = arith.constant 0 : i32
    %c0_i32_0 = arith.constant 0 : i32
    return %arg0, %c0_i32 : i32, i32
  }
  func.func @transform_1(%arg0: i32) -> (i32, i32) {
    %c0_i32 = arith.constant 0 : i32
    %c0_i32_0 = arith.constant 0 : i32
    %c0_i32_1 = arith.constant 0 : i32
    return %c0_i32, %c0_i32_0 : i32, i32
  }
  func.func @transform_2(%arg0: i32) -> (i32, i32) {
    %c0_i32 = arith.constant 0 : i32
    %c0_i32_0 = arith.constant 0 : i32
    %c0_i32_1 = arith.constant 0 : i32
    return %c0_i32, %c0_i32_0 : i32, i32
  }
  func.func @transform_3(%arg0: i32) -> (i32, i32) {
    %c0_i32 = arith.constant 0 : i32
    %c0_i32_0 = arith.constant 0 : i32
    return %arg0, %c0_i32 : i32, i32
  }
}

</mosaic_0001>

<bundles_post_ra>
// kernel: tpu_custom_call.1
= control target key start
LH: loop header
LB: loop body
LE: loop exit
PB: predicated region body
PF: predicated region fallthrough
CT: control target
= control target key end

     0   :  { %8 = vsyncpa [#allocation3], 0  ;;  %s877_s0 = inlined_call_operand.hbm [shape: f32[32,512], index: 0, kind: input, shape index: {}]   ;;  %s878_s1 = inlined_call_operand.hbm [shape: f32[512,128], index: 1, kind: input, shape index: {}]   ;;  %s879_s2 = inlined_call_operand.vmem [shape: f32[1,128], index: 2, kind: input, shape index: {}]   ;;  %s880_s3 = inlined_call_operand.hbm [shape: f32[32,128], index: 3, kind: output, shape index: {}]  }
   0x1   :  { %10 = vsyncpa [#allocation3 + $0x1], 0 }
   0x2   :  { %11 = vsyncpa [#allocation6], 0 }
   0x3   :  { %12 = vsyncpa [#allocation4], 0 }
   0x4   :  { %14 = vsyncpa [#allocation4 + $0x1], 0  ;;  %s723_s12 = smov 0   ;;  %s725_s13 = smov 0  }
   0x5   :  { %s727_s14 = smov 0   ;;  %s729_s15 = smov 0  }
   0x6 LB: > { %s744_s16 = sadd.s32 4294967295, %s694_s15   ;;  %s480_s17 = sadd.s32 4294967294, %s694_s15   ;;  %s694_s15 = sphi %s729_s15, %s890_s15   ;;  %s690_s14 = sphi %s727_s14, %s889_s14   ;;  %s686_s13 = sphi %s725_s13, %s888_s13   ;;  %s682_s12 = sphi %s723_s12, %s887_s12  }
   0x7   : > { %p40_p0 = scmp.ne.s32.totalorder %s686_s13, %s682_s12  ;;  %p41_p1 = scmp.eq.s32.totalorder %s744_s16, 0 }
   0x8   : > { %p106_p2 = scmp.eq.s32.totalorder %s744_s16, 1  ;;  %p112_p3 = scmp.eq.s32.totalorder %s480_s17, 1 }
   0x9   : > { %p753_p4 = por %p41_p1, %p40_p0  ;;  %p481_p5 = scmp.ge.s32.totalorder %s694_s15, 1 }
   0xa   : > { %p758_p6 = por %p112_p3, %p40_p0  ;;  %p119_p7 = scmp.lt.s32.totalorder %s694_s15, 3 }
   0xb   : > { %s130_s22 = sshll.u32 %s878_s1, 4  ;;  %s696_s24 = smov [#allocation5]   ;;  %s131_s22 = int_to_ptr.hbm [resolvable:$true] %s130_s22 }
   0xc   : > { %p766_p8 = pnand %p481_p5, %p119_p7  ;;  %s132_s25 = sshll.u32 %s696_s24, 4  ;;  %s133_s25 = int_to_ptr.vmem [resolvable:$true] %s132_s25 }
   0xd   : > { %s776_s26 = sadd.s32 1, %s694_s15   ;;  %s697_s27 = smov 128  }
   0xe   : > { %p508_p9 = pneg %p766_p8  ;;  %s698_s28 = smov 8  }
   0xf   : > { %s24_s29 = ssub.s32 %s694_s15, %s776_s26  ;;  %s27_s30 = sadd.s32 1, %s690_s14 }
  0x10   : > { %p509_p10 = pnand %p508_p9, %p41_p1  ;;  %p25_p12 = scmp.eq.s32.totalorder %s24_s29, 0 }
  0x11   : > { %p34_p13 = scmp.ne.s32.totalorder %s690_s14, %s686_s13  ;;  %p35_p0 = scmp.eq.s32.totalorder %s694_s15, 0 }
  0x12   : > { %511 = dma.hbm_to_vmem [thread:$0]  (!%p509_p10), %s131_s22, 8192, %s133_s25, [#allocation6], %s697_s27, %s697_s27, %s698_s28  }
  0x13   : > { %p521_p3 = scmp.lt.s32.totalorder %s694_s15, 2  ;;  %p36_p5 = por %p35_p0, %p34_p13 }
  0x14   : > { %s786_s4 = scalar_select %p25_p12, %s690_s14, %s27_s30  }
  0x15   : > { %p790_p7 = por %p106_p2, %p34_p13  ;;  %s149_s6 = sand.u32 1, %s690_s14  }
  0x16   : > { %s498_s7 = sshll.u32 %s694_s15, 6  ;;  %s484_s8 = sshll.u32 %s149_s6, 6 }
  0x17   : > { %s159_s11 = scalar_lea.hbm %s877_s0, %s498_s7  ;;  %s153_s20 = scalar_lea.vmem [#allocation2], %s484_s8 }
  0x18   : > { %s160_s17 = sshll.u32 %s159_s11, 4  ;;  %s162_s21 = sshll.u32 %s153_s20, 4  ;;  %s161_s17 = int_to_ptr.hbm [resolvable:$true] %s160_s17  ;;  %s163_s21 = int_to_ptr.vmem [resolvable:$true] %s162_s21 }
  0x19   : > { %p801_p9 = pnand %p521_p3, %p36_p5  ;;  %s150_s24 = scalar_lea.sflag [#allocation3], %s149_s6 }
  0x1a   : > { %s594_s25 = sshra.s32 %s161_s17, 4  ;;  %s601_s30 = scalar_lea.hbm %s877_s0, 128  ;;  %s595_s25 = int_to_ptr.hbm [resolvable:$true] %s594_s25 }
  0x1b   : > { %s596_s27 = scalar_lea.hbm %s595_s25, 64  ;;  %p598_p10 = pneg %p801_p9 }
  0x1c   : > { %p597_p2 = scmp.ne.s32.totalorder %s595_s25, %s596_s27  ;;  %p602_p0 = scmp.lt.s32.totalorder %s595_s25, %s877_s0 }
  0x1d   : > { %p603_p3 = scmp.lt.s32.totalorder %s601_s30, %s596_s27 }
  0x1e   : > { %p599_p12 = pnand %p598_p10, %p597_p2 }
  0x1f   : > { %p604_p5 = por %p603_p3, %p602_p0 }
  0x20   : > { %p600_p13 = pneg %p599_p12 }
  0x22   : > { %p605_p11 = pnand %p604_p5, %p600_p13 }
  0x24   : > { %608 = shalt.err (!%p605_p11)
}
  0x25   : > { %s699_s6 = smov 512   ;;  %s700_s9 = smov 32  }
  0x26   : > { %515 = dma.hbm_to_vmem [thread:$0]  (!%p801_p9), %s161_s17, 1024, %s163_s21, %s150_s24, %s699_s6, %s699_s6, %s700_s9  }
  0x27   : > { %174 = sbr.rel (%p766_p8) target bundleno = 228 (0xe4), region = 32  ;;  %s818_s10 = sand.u32 (!%p766_p8), 1, %s686_s13  }
  0x28   : > { %s489_s11 = sshll.u32 (!%p766_p8), %s818_s10, 6  ;;  %s177_s20 = scalar_lea.sflag (!%p766_p8), [#allocation3], %s818_s10 }
  0x29   : > { %s822_s25 = scalar_lea.vmem (!%p766_p8), [#allocation2], %s489_s11 }
  0x2c   : > { %669 = dma.done.wait (%p753_p4), %s177_s20, 1024  }
  0x2d   : > { %671 = vsyncadd (%p753_p4), %s177_s20, 4294966272 }
  0x2e   : > { %673 = dma.done.wait (%p41_p1), [#allocation6], 8192  }
  0x2f   : > { %675 = vsyncadd (%p41_p1), [#allocation6], 4294959104  ;;  %v266_v0 = vld [vmem:[#allocation5 + $0x178] sm:$0xff]  ;;  %v265_v2 = vld [vmem:[#allocation5 + $0x170] sm:$0xff]  ;;  %s491_s17 = sshll.u32 %s818_s10, 4  ;;  %s499_s21 = sshll.u32 %s744_s16, 4 }
  0x30   : > { %v234_v1 = vld [vmem:[#allocation5 + $0x78] sm:$0xff]  ;;  %333 = vmatpush.msra.mxu2 %v266_v0  ;;  %v233_v4 = vld [vmem:[#allocation5 + $0x70] sm:$0xff]  ;;  %v264_v6 = vld [vmem:[#allocation5 + $0x168] sm:$0xff]  ;;  %s393_s27 = scalar_lea.hbm %s880_s3, %s499_s21  ;;  %s208_s28 = scalar_lea.vmem [#allocation7], %s491_s17 }
  0x31   : > { %287 = vmatpush.msra.mxu0 %v234_v1  ;;  %v282_v3 = vld [vmem:[#allocation5 + $0x1f8] sm:$0xff]  ;;  %v281_v7 = vld [vmem:[#allocation5 + $0x1f0] sm:$0xff]  ;;  %v232_v8 = vld [vmem:[#allocation5 + $0x68] sm:$0xff]  ;;  %s394_s29 = sshll.u32 %s208_s28, 4  ;;  %s396_s30 = sshll.u32 %s393_s27, 4  ;;  %s395_s29 = int_to_ptr.vmem [resolvable:$true] %s394_s29  ;;  %s397_s30 = int_to_ptr.hbm [resolvable:$true] %s396_s30 }
  0x32   : > { %v250_v5 = vld [vmem:[#allocation5 + $0xf8] sm:$0xff]  ;;  %356 = vmatpush.msra.mxu3 %v282_v3  ;;  %334 = vmatpush.msra.mxu2 %v265_v2  ;;  %v249_v9 = vld [vmem:[#allocation5 + $0xf0] sm:$0xff]  ;;  %v280_v10 = vld [vmem:[#allocation5 + $0x1e8] sm:$0xff]  ;;  %s382_s16 = scalar_lea.sflag [#allocation4], %s818_s10  ;;  %s638_s7 = sshra.s32 %s397_s30, 4  ;;  %s639_s7 = int_to_ptr.hbm [resolvable:$true] %s638_s7 }
  0x33   : > { %310 = vmatpush.msra.mxu1 %v250_v5  ;;  %288 = vmatpush.msra.mxu0 %v233_v4  ;;  %v263_v11 = vld [vmem:[#allocation5 + $0x160] sm:$0xff]  ;;  %v248_v13 = vld [vmem:[#allocation5 + $0xe8] sm:$0xff]  ;;  %v262_v16 = vld [vmem:[#allocation5 + $0x158] sm:$0xff]  ;;  %s640_s8 = scalar_lea.hbm %s639_s7, 16  ;;  %s644_s11 = scalar_lea.hbm %s880_s3, 32 }
  0x34   : > { %357 = vmatpush.msra.mxu3 %v281_v7  ;;  %v231_v12 = vld [vmem:[#allocation5 + $0x60] sm:$0xff]  ;;  %335 = vmatpush.msra.mxu2 %v264_v6  ;;  %v230_v17 = vld [vmem:[#allocation5 + $0x58] sm:$0xff]  ;;  %v261_v20 = vld [vmem:[#allocation5 + $0x150] sm:$0xff]  ;;  %p641_p1 = scmp.ne.s32.totalorder %s639_s7, %s640_s8  ;;  %p645_p11 = scmp.lt.s32.totalorder %s639_s7, %s880_s3 }
  0x35   : > { %311 = vmatpush.msra.mxu1 %v249_v9  ;;  %289 = vmatpush.msra.mxu0 %v232_v8  ;;  %v279_v14 = vld [vmem:[#allocation5 + $0x1e0] sm:$0xff]  ;;  %v278_v18 = vld [vmem:[#allocation5 + $0x1d8] sm:$0xff]  ;;  %v229_v21 = vld [vmem:[#allocation5 + $0x50] sm:$0xff]  ;;  %p646_p9 = scmp.lt.s32.totalorder %s644_s11, %s640_s8 }
  0x36   : > { %v247_v15 = vld [vmem:[#allocation5 + $0xe0] sm:$0xff]  ;;  %358 = vmatpush.msra.mxu3 %v280_v10  ;;  %336 = vmatpush.msra.mxu2 %v263_v11  ;;  %v246_v19 = vld [vmem:[#allocation5 + $0xd8] sm:$0xff]  ;;  %v277_v22 = vld [vmem:[#allocation5 + $0x1d0] sm:$0xff]  ;;  %p642_p4 = pnand %p641_p1, %p790_p7 }
  0x37   : > { %312 = vmatpush.msra.mxu1 %v248_v13  ;;  %290 = vmatpush.msra.mxu0 %v231_v12  ;;  %v245_v23 = vld [vmem:[#allocation5 + $0xd0] sm:$0xff]  ;;  %v260_v24 = vld [vmem:[#allocation5 + $0x148] sm:$0xff]  ;;  %v259_v28 = vld [vmem:[#allocation5 + $0x140] sm:$0xff]  ;;  %p647_p2 = por %p646_p9, %p645_p11 }
  0x38   : > { %359 = vmatpush.msra.mxu3 %v279_v14  ;;  %337 = vmatpush.msra.mxu2 %v262_v16  ;;  %v228_v25 = vld [vmem:[#allocation5 + $0x48] sm:$0xff]  ;;  %v227_v29 = vld [vmem:[#allocation5 + $0x40] sm:$0xff]  ;;  %v258_v32 = vld [vmem:[#allocation5 + $0x138] sm:$0xff]  ;;  %p643_p8 = pneg %p642_p4 }
  0x39   : > { %313 = vmatpush.msra.mxu1 %v247_v15  ;;  %291 = vmatpush.msra.mxu0 %v230_v17  ;;  %v276_v26 = vld [vmem:[#allocation5 + $0x1c8] sm:$0xff]  ;;  %v275_v30 = vld [vmem:[#allocation5 + $0x1c0] sm:$0xff]  ;;  %v226_v33 = vld [vmem:[#allocation5 + $0x38] sm:$0xff] }
  0x3a   : > { %360 = vmatpush.msra.mxu3 %v278_v18  ;;  %338 = vmatpush.msra.mxu2 %v261_v20  ;;  %v244_v27 = vld [vmem:[#allocation5 + $0xc8] sm:$0xff]  ;;  %v243_v31 = vld [vmem:[#allocation5 + $0xc0] sm:$0xff]  ;;  %v274_v34 = vld [vmem:[#allocation5 + $0x1b8] sm:$0xff]  ;;  %p648_p10 = pnand %p647_p2, %p643_p8 }
  0x3b   : > { %314 = vmatpush.msra.mxu1 %v246_v19  ;;  %292 = vmatpush.msra.mxu0 %v229_v21  ;;  %v242_v35 = vld [vmem:[#allocation5 + $0xb8] sm:$0xff]  ;;  %v257_v36 = vld [vmem:[#allocation5 + $0x130] sm:$0xff]  ;;  %v256_v40 = vld [vmem:[#allocation5 + $0x128] sm:$0xff] }
  0x3c   : > { %361 = vmatpush.msra.mxu3 %v277_v22  ;;  %339 = vmatpush.msra.mxu2 %v260_v24  ;;  %v225_v37 = vld [vmem:[#allocation5 + $0x30] sm:$0xff]  ;;  %v224_v41 = vld [vmem:[#allocation5 + $0x28] sm:$0xff]  ;;  %v255_v44 = vld [vmem:[#allocation5 + $0x120] sm:$0xff] }
  0x3d   : > { %315 = vmatpush.msra.mxu1 %v245_v23  ;;  %293 = vmatpush.msra.mxu0 %v228_v25  ;;  %v273_v38 = vld [vmem:[#allocation5 + $0x1b0] sm:$0xff]  ;;  %v272_v42 = vld [vmem:[#allocation5 + $0x1a8] sm:$0xff]  ;;  %v223_v45 = vld [vmem:[#allocation5 + $0x20] sm:$0xff] }
  0x3e   : > { %362 = vmatpush.msra.mxu3 %v276_v26  ;;  %340 = vmatpush.msra.mxu2 %v259_v28  ;;  %v241_v39 = vld [vmem:[#allocation5 + $0xb0] sm:$0xff]  ;;  %v240_v43 = vld [vmem:[#allocation5 + $0xa8] sm:$0xff]  ;;  %v271_v46 = vld [vmem:[#allocation5 + $0x1a0] sm:$0xff] }
  0x3f   : > { %316 = vmatpush.msra.mxu1 %v244_v27  ;;  %294 = vmatpush.msra.mxu0 %v227_v29  ;;  %v239_v47 = vld [vmem:[#allocation5 + $0xa0] sm:$0xff]  ;;  %v254_v48 = vld [vmem:[#allocation5 + $0x118] sm:$0xff]  ;;  %v253_v52 = vld [vmem:[#allocation5 + $0x110] sm:$0xff] }
  0x40   : > { %363 = vmatpush.msra.mxu3 %v275_v30  ;;  %341 = vmatpush.msra.mxu2 %v258_v32  ;;  %v222_v49 = vld [vmem:[#allocation5 + $0x18] sm:$0xff]  ;;  %v221_v53 = vld [vmem:[#allocation5 + $0x10] sm:$0xff]  ;;  %v252_v56 = vld [vmem:[#allocation5 + $0x108] sm:$0xff] }
  0x41   : > { %317 = vmatpush.msra.mxu1 %v243_v31  ;;  %295 = vmatpush.msra.mxu0 %v226_v33  ;;  %v270_v50 = vld [vmem:[#allocation5 + $0x198] sm:$0xff]  ;;  %v269_v54 = vld [vmem:[#allocation5 + $0x190] sm:$0xff]  ;;  %v220_v57 = vld [vmem:[#allocation5 + $0x8] sm:$0xff] }
  0x42   : > { %364 = vmatpush.msra.mxu3 %v274_v34  ;;  %342 = vmatpush.msra.mxu2 %v257_v36  ;;  %v238_v51 = vld [vmem:[#allocation5 + $0x98] sm:$0xff]  ;;  %v237_v55 = vld [vmem:[#allocation5 + $0x90] sm:$0xff]  ;;  %v268_v58 = vld [vmem:[#allocation5 + $0x188] sm:$0xff] }
  0x43   : > { %318 = vmatpush.msra.mxu1 %v242_v35  ;;  %296 = vmatpush.msra.mxu0 %v225_v37  ;;  %v236_v59 = vld [vmem:[#allocation5 + $0x88] sm:$0xff]  ;;  %v251_v60 = vld [vmem:[#allocation5 + $0x100] sm:$0xff]  ;;  %v213_v62 = vld [vmem:[%s822_s25 + $0x10] sm:$0xff] }
  0x44   : > { %365 = vmatpush.msra.mxu3 %v273_v38  ;;  %343 = vmatpush.msra.mxu2 %v256_v40  ;;  %v219_v61 = vld [vmem:[#allocation5] sm:$0xff]  ;;  %v214_v1 = vld [vmem:[%s822_s25 + $0x18] sm:$0xff]  ;;  %v212_v3 = vld [vmem:[%s822_s25 + $0x8] sm:$0xff] }
  0x45   : > { %319 = vmatpush.msra.mxu1 %v241_v39  ;;  %297 = vmatpush.msra.mxu0 %v224_v41  ;;  %v267_v63 = vld [vmem:[#allocation5 + $0x180] sm:$0xff]  ;;  %v217_v4 = vld [vmem:[%s822_s25 + $0x30] sm:$0xff]  ;;  %v218_v6 = vld [vmem:[%s822_s25 + $0x38] sm:$0xff] }
  0x46   : > { %366 = vmatpush.msra.mxu3 %v272_v42  ;;  %344 = vmatpush.msra.mxu2 %v255_v44  ;;  %v211_v0 = vld [vmem:[%s822_s25] sm:$0xff]  ;;  %v216_v7 = vld [vmem:[%s822_s25 + $0x28] sm:$0xff] }
  0x47   : > { %320 = vmatpush.msra.mxu1 %v240_v43  ;;  %298 = vmatpush.msra.mxu0 %v223_v45  ;;  %v235_v2 = vld [vmem:[#allocation5 + $0x80] sm:$0xff] }
  0x48   : > { %367 = vmatpush.msra.mxu3 %v271_v46  ;;  %345 = vmatpush.msra.mxu2 %v254_v48  ;;  %v215_v5 = vld [vmem:[%s822_s25 + $0x20] sm:$0xff] }
  0x49   : > { %321 = vmatpush.msra.mxu1 %v239_v47  ;;  %299 = vmatpush.msra.mxu0 %v222_v49  ;;  %v563_v8 = vld [vmem:[%s879_s2] ss:$0 sm:$0xff] }
  0x4a   : > { %368 = vmatpush.msra.mxu3 %v270_v50  ;;  %346 = vmatpush.msra.mxu2 %v253_v52 }
  0x4b   : > { %322 = vmatpush.msra.mxu1 %v238_v51  ;;  %300 = vmatpush.msra.mxu0 %v221_v53 }
  0x4c   : > { %369 = vmatpush.msra.mxu3 %v269_v54  ;;  %347 = vmatpush.msra.mxu2 %v252_v56 }
  0x4d   : > { %323 = vmatpush.msra.mxu1 %v237_v55  ;;  %301 = vmatpush.msra.mxu0 %v220_v57 }
  0x4e   : > { %370 = vmatpush.msra.mxu3 %v268_v58  ;;  %348 = vmatpush.msra.mxu2 %v251_v60 }
  0x4f   : > { %324 = vmatpush.msra.mxu1 %v236_v59  ;;  %302 = vmatpush.msra.mxu0 %v219_v61 }
  0x50   : > { %349 = vmatmul.f32.vlgmr.msra.gmra.mxu2 %v213_v62  ;;  %371 = vmatpush.msra.mxu3 %v267_v63 }
  0x51   : > { %303 = vmatmul.f32.vlgmr.msra.gmra.mxu0 %v211_v0  ;;  %372 = vmatmul.f32.vlgmr.msra.gmra.mxu3 %v214_v1 }
  0x52   : > { %325 = vmatpush.msra.mxu1 %v235_v2 }
  0x53   : > { %326 = vmatmul.f32.vlgmr.msra.gmra.mxu1 %v212_v3 }
  0x58   : > { %352 = vmatmul.f32.gmra.mxu2 %v217_v4 }
  0x59   : > { %306 = vmatmul.f32.gmra.mxu0 %v215_v5  ;;  %375 = vmatmul.f32.gmra.mxu3 %v218_v6 }
  0x5b   : > { %329 = vmatmul.f32.gmra.mxu1 %v216_v7 }
  0xce   : > { %v304_v9 = vpop.f32.mrf.mxu0 }
  0xcf   : > { %v305_v10 = vadd.f32 %v563_v8, %v304_v9 }
  0xd0   : > { %v327_v11 = vpop.f32.mrf.mxu1 }
  0xd1   : > { %v328_v12 = vadd.f32 %v327_v11, %v305_v10 }
  0xd3   : > { %v350_v13 = vpop.f32.mrf.mxu2 }
  0xd4   : > { %v351_v14 = vadd.f32 %v350_v13, %v328_v12  ;;  %v373_v15 = vpop.f32.mrf.mxu3 }
  0xd6   : > { %v374_v16 = vadd.f32 %v373_v15, %v351_v14  ;;  %v307_v17 = vpop.f32.mrf.mxu0 }
  0xd7   : > { %v308_v18 = vadd.f32 %v563_v8, %v307_v17 }
  0xd8   : > { %379 = vst [vmem:[%s208_s28] sm:$0xff] %v374_v16  ;;  %v330_v19 = vpop.f32.mrf.mxu1 }
  0xd9   : > { %v331_v20 = vadd.f32 %v330_v19, %v308_v18 }
  0xdb   : > { %v353_v21 = vpop.f32.mrf.mxu2 }
  0xdc   : > { %v354_v22 = vadd.f32 %v353_v21, %v331_v20  ;;  %v376_v23 = vpop.f32.mrf.mxu3 }
  0xde   : > { %v377_v24 = vadd.f32 %v376_v23, %v354_v22 }
  0xe0   : > { %380 = vst [vmem:[%s208_s28 + $0x8] sm:$0xff] %v377_v24 }
  0xe1   : > { %651 = shalt.err (!%p648_p10)
}
  0xe2   : > { %s701_s10 = smov 128   ;;  %s702_s18 = smov 8  }
  0xe3   : > { %506 = dma.vmem_to_hbm [thread:$0]  (%p790_p7), %s395_s29, 256, %s397_s30, %s382_s16, %s701_s10, %s701_s10, %s702_s18  }
  0xe4 PF: > { %s411_s23 = sand.u32 1, %s682_s12   ;;  %p886_p12 = scmp.ge.s32.totalorder %s694_s15, 2 }
  0xe5   : > { %s412_s17 = scalar_lea.sflag [#allocation4], %s411_s23 }
  0xe6   : > { %p517_p13 = pnand %p886_p12, %p758_p6 }
  0xe8   : > { %p518_p0 = pneg %p517_p13 }
  0xea   : > { %677 = dma.done.wait (%p518_p0), %s412_s17, 256  }
  0xeb   : > { %679 = vsyncadd (%p518_p0), %s412_s17, 4294967040  ;;  %p17_p3 = scmp.ge.s32.totalorder %s776_s26, 4   ;;  %s887_s12 = smov %s686_s13 }
  0xec   : > { %s888_s13 = smov %s690_s14  ;;  %s889_s14 = smov %s786_s4 }
  0xed   : > { %s890_s15 = smov %s776_s26  ;;  %19 = sbr.rel (!%p17_p3) target bundleno = 6 (0x6), region = 81 }
  0xf2   :  { %418 = vsyncpa [#allocation3], 1 }
  0xf3   :  { %420 = vsyncpa [#allocation3 + $0x1], 1 }
  0xf4   :  { %421 = vsyncpa [#allocation6], 1 }
  0xf5   :  { %422 = vsyncpa [#allocation4], 1 }
  0xf6   :  { %424 = vsyncpa [#allocation4 + $0x1], 1 }

</bundles_post_ra>
